<compile_context>
chip_gen: v6e
topology: v6e:2x2x1
jax: 0.10.0
libtpu: 0.0.40
codegen_flags: <defaults>
</compile_context>

<pallas_src>
import functools

import jax
import jax.numpy as jnp
from jax.experimental import pallas as pl
from jax.experimental.pallas import tpu as pltpu


def _round_up(x, m):
    return ((x + m - 1) // m) * m


# ---------------------------------------------------------------------------
# Pass 1: global average pool (f32 accumulation) + SE-MLP -> attn (B, 1, C)
# ---------------------------------------------------------------------------
def _pool_attn_kernel(d_ref, e_ref, w1_ref, b1_ref, w2_ref, b2_ref,
                      attn_ref, acc_d_ref, acc_e_ref, *, inv_hw):
    # d_ref: (1, Cd, hw_tile)   e_ref: (1, Ce, hw_tile)
    # w1: (C, Ch)  b1: (1, Ch)  w2: (Ch, C)  b2: (1, C)   (all f32, resident)
    # attn_ref: (1, 1, C) f32 output (resident across the hw axis)
    # acc_*_ref: (1, Cd)/(1, Ce) f32 scratch accumulators
    h = pl.program_id(1)
    cd = d_ref.shape[1]

    @pl.when(h == 0)
    def _():
        acc_d_ref[...] = jnp.zeros_like(acc_d_ref)
        acc_e_ref[...] = jnp.zeros_like(acc_e_ref)

    # f32 accumulation of per-channel sums without materializing an f32 copy
    # of the whole per-batch slab (temporaries are bounded by one hw tile).
    acc_d_ref[...] += jnp.sum(d_ref[...], axis=-1, dtype=jnp.float32)
    acc_e_ref[...] += jnp.sum(e_ref[...], axis=-1, dtype=jnp.float32)

    @pl.when(h == pl.num_programs(1) - 1)
    def _():
        pooled_d = acc_d_ref[...] * inv_hw                        # (1, Cd)
        pooled_e = acc_e_ref[...] * inv_hw                        # (1, Ce)
        # [pooled_d, pooled_e] @ W1  ==  pooled_d @ W1[:Cd] + pooled_e @ W1[Cd:]
        # (avoids an in-kernel lane concat of the pooled vector).
        hid = (jnp.dot(pooled_d, w1_ref[:cd, :],
                       preferred_element_type=jnp.float32)
               + jnp.dot(pooled_e, w1_ref[cd:, :],
                         preferred_element_type=jnp.float32)
               + b1_ref[...])
        hid = jnp.maximum(hid, 0.0)                               # (1, Ch)
        logits = jnp.dot(hid, w2_ref[...],
                         preferred_element_type=jnp.float32) + b2_ref[...]
        attn_ref[...] = jax.nn.sigmoid(logits).reshape(attn_ref.shape)


# ---------------------------------------------------------------------------
# Pass 2: channel re-weighting, writing both channel ranges of the fused output
# ---------------------------------------------------------------------------
def _scale_kernel(attn_ref, d_ref, e_ref, out_ref):
    # attn_ref: (1, C, 1) f32   d_ref: (1, Cd, hw_tile)   e_ref: (1, Ce, hw_tile)
    # out_ref: (1, C, hw_tile)
    cd = d_ref.shape[1]
    attn = attn_ref[...]                                          # (1, C, 1) f32
    attn_d = attn[:, :cd, :]                                      # (1, Cd, 1)
    attn_e = attn[:, cd:, :]                                      # (1, Ce, 1)
    d = d_ref[...]
    e = e_ref[...]
    # Scale in the input dtype; only the tiny attn vector is cast.
    out_ref[:, :cd, :] = (d * attn_d.astype(d.dtype)).astype(out_ref.dtype)
    out_ref[:, cd:, :] = (e * attn_e.astype(e.dtype)).astype(out_ref.dtype)


@jax.jit
def caff_forward(d, e, w1, b1, w2, b2):
    """d: (B, Cd, H, W), e: (B, Ce, He, We); returns (B, Cd+Ce, H, W)."""
    B, Cd, H, W = d.shape
    _, Ce, He, We = e.shape
    C = Cd + Ce
    hidden = w1.shape[1]

    if (He, We) != (H, W):
        # bilinear, align_corners=False, antialias=False: matches the
        # torch.nn.functional.interpolate default for up- AND down-sampling.
        # TODO(synk): fuse the integer-factor bilinear upscale into the Pallas
        # kernels to avoid the extra HBM write+read of the resized e.
        e = jax.image.resize(e, (B, Ce, H, W), method="bilinear",
                             antialias=False)

    out_dtype = jnp.result_type(d.dtype, e.dtype)
    HW = H * W

    # Keep native dtypes in HBM (no upcast before the kernel).
    d_flat = d.reshape(B, Cd, HW)
    e_flat = e.reshape(B, Ce, HW)
    w1f = w1.astype(jnp.float32)
    b1f = b1.astype(jnp.float32)
    w2f = w2.astype(jnp.float32)
    b2f = b2.astype(jnp.float32)

    # ---- hw tile selection: lane-dense (multiple of 128), VMEM-bounded ------
    lane = 128
    d_bytes = jnp.dtype(d_flat.dtype).itemsize
    e_bytes = jnp.dtype(e_flat.dtype).itemsize
    o_bytes = jnp.dtype(out_dtype).itemsize
    bytes_per_lane = Cd * d_bytes + Ce * e_bytes + C * o_bytes

    tile_budget = 8 << 20  # target for the double-buffered d/e/out blocks
    hw_cover = _round_up(HW, lane)
    hw_tile = max(lane, min(hw_cover, 4096,
                            (tile_budget // (2 * bytes_per_lane)) // lane * lane))
    if B == 1 and hw_tile == hw_cover and hw_tile >= 2 * lane:
        # Guarantee a parallel grid extent >= 2 so both v7x TCs get work.
        hw_tile = _round_up(hw_tile // 2, lane)
    HWp = _round_up(HW, hw_tile)
    if HWp != HW:
        pad = HWp - HW
        d_flat = jnp.pad(d_flat, ((0, 0), (0, 0), (0, pad)))
        e_flat = jnp.pad(e_flat, ((0, 0), (0, 0), (0, pad)))
    n_hw = HWp // hw_tile

    # ---- VMEM limit: honest per-step footprint + headroom under physical ----
    step_bytes = hw_tile * bytes_per_lane
    weight_bytes = 4 * (w1f.size + b1f.size + w2f.size + b2f.size) + 4 * C
    try:
        vmem_cap = int(pltpu.get_tpu_info().vmem_capacity_bytes)
    except Exception:
        vmem_cap = 64 << 20  # conservative (v7x-sized) fallback
    vmem_limit = int(max(min(2 * step_bytes + weight_bytes + (8 << 20),
                             vmem_cap - (12 << 20)),
                         32 << 20))

    # ------------------------- pass 1: pool + attn ---------------------------
    pool_kernel = functools.partial(_pool_attn_kernel, inv_hw=1.0 / HW)
    attn = pl.pallas_call(
        pool_kernel,
        out_shape=jax.ShapeDtypeStruct((B, 1, C), jnp.float32),
        grid_spec=pltpu.PrefetchScalarGridSpec(
            num_scalar_prefetch=0,
            grid=(B, n_hw),
            in_specs=[
                pl.BlockSpec((1, Cd, hw_tile), lambda b, h: (b, 0, h)),
                pl.BlockSpec((1, Ce, hw_tile), lambda b, h: (b, 0, h)),
                pl.BlockSpec((C, hidden), lambda b, h: (0, 0)),   # w1 resident
                pl.BlockSpec((1, hidden), lambda b, h: (0, 0)),   # b1
                pl.BlockSpec((hidden, C), lambda b, h: (0, 0)),   # w2
                pl.BlockSpec((1, C), lambda b, h: (0, 0)),        # b2
            ],
            out_specs=pl.BlockSpec((1, 1, C), lambda b, h: (b, 0, 0)),
            scratch_shapes=[pltpu.VMEM((1, Cd), jnp.float32),
                            pltpu.VMEM((1, Ce), jnp.float32)],
        ),
        compiler_params=pltpu.CompilerParams(
            dimension_semantics=("parallel", "arbitrary"),
            vmem_limit_bytes=vmem_limit,
        ),
    )(d_flat, e_flat, w1f, b1f, w2f, b2f)

    # Tiny (B*C*4 bytes) relayout so per-channel attn sits on the sublane axis
    # for broadcasting inside pass 2 (avoids a per-tile in-kernel transpose).
    attn_col = jnp.transpose(attn, (0, 2, 1))                     # (B, C, 1)

    # --------------------------- pass 2: scale -------------------------------
    # Note: pipeline depth on d/e specs (pl.Buffered(3)) is a tunable knob for
    # this pure-DMA pass; left at the default 2 to keep v7x VMEM headroom.
    out_flat = pl.pallas_call(
        _scale_kernel,
        out_shape=jax.ShapeDtypeStruct((B, C, HWp), out_dtype),
        grid_spec=pltpu.PrefetchScalarGridSpec(
            num_scalar_prefetch=0,
            grid=(B, n_hw),
            in_specs=[
                pl.BlockSpec((1, C, 1), lambda b, h: (b, 0, 0)),  # attn (resident per b)
                pl.BlockSpec((1, Cd, hw_tile), lambda b, h: (b, 0, h)),
                pl.BlockSpec((1, Ce, hw_tile), lambda b, h: (b, 0, h)),
            ],
            out_specs=pl.BlockSpec((1, C, hw_tile), lambda b, h: (b, 0, h)),
        ),
        compiler_params=pltpu.CompilerParams(
            dimension_semantics=("parallel", "parallel"),
            vmem_limit_bytes=vmem_limit,
        ),
    )(attn_col, d_flat, e_flat)

    if HWp != HW:
        out_flat = out_flat[:, :, :HW]
    return out_flat.reshape(B, C, H, W)


def init_caff_params(key, d_channels, e_channels):
    """Deterministic synthetic params matching nn.Linear shapes.
    PyTorch Linear(in, out) has weight (out, in); we store the transpose so
    the kernel computes x @ W_t + b directly."""
    C = d_channels + e_channels
    assert C >= 16, "fused_channels // 16 would be 0 (matches PyTorch pitfall)"
    hidden = C // 16
    k1, k2, k3, k4 = jax.random.split(key, 4)
    w1 = jax.random.normal(k1, (C, hidden), jnp.float32) * (1.0 / jnp.sqrt(C))
    b1 = jax.random.normal(k2, (1, hidden), jnp.float32) * 0.01
    w2 = jax.random.normal(k3, (hidden, C), jnp.float32) * (1.0 / jnp.sqrt(hidden))
    b2 = jax.random.normal(k4, (1, C), jnp.float32) * 0.01
    return w1, b1, w2, b2


def caff_reference(d, e, w1, b1, w2, b2):
    """Pure-JAX reference for correctness check."""
    B, Cd, H, W = d.shape
    _, Ce, He, We = e.shape
    if (He, We) != (H, W):
        e = jax.image.resize(e, (B, Ce, H, W), method="bilinear",
                             antialias=False)
    fused = jnp.concatenate([d, e], axis=1).astype(jnp.float32)
    pooled = fused.mean(axis=(2, 3))
    h = jnp.maximum(pooled @ w1 + b1, 0.0)
    attn = jax.nn.sigmoid(h @ w2 + b2)
    return fused * attn[:, :, None, None]


if __name__ == "__main__":
    key = jax.random.PRNGKey(0)
    kd, ke, kp = jax.random.split(key, 3)

    d_channels, e_channels = 32, 32   # fused C = 64, hidden = 4
    B, H, W = 2, 16, 16
    d = jax.random.normal(kd, (B, d_channels, H, W), jnp.float32)
    # e has a smaller spatial size -> exercises the bilinear-resize branch
    e = jax.random.normal(ke, (B, e_channels, H // 2, W // 2), jnp.float32)

    w1, b1, w2, b2 = init_caff_params(kp, d_channels, e_channels)

    out = caff_forward(d, e, w1, b1, w2, b2)
    out = jax.block_until_ready(out)

    ref = caff_reference(d, e, w1, b1, w2, b2)
    assert out.shape == (B, d_channels + e_channels, H, W)
    assert jnp.allclose(out, ref, atol=1e-3, rtol=1e-3), "mismatch vs reference"

    print("KERNEL_OK")
</pallas_src>

<mosaic_0001>
module attributes {stable_mosaic.version = 11 : i64} {
  func.func @_pool_attn_kernel(%arg0: i32, %arg1: i32, %arg2: memref<1x32x256xf32, #tpu.memory_space<vmem>>, %arg3: memref<1x32x256xf32, #tpu.memory_space<vmem>>, %arg4: memref<64x4xf32, #tpu.memory_space<vmem>>, %arg5: memref<1x4xf32, #tpu.memory_space<vmem>>, %arg6: memref<4x64xf32, #tpu.memory_space<vmem>>, %arg7: memref<1x64xf32, #tpu.memory_space<vmem>>, %arg8: memref<1x1x64xf32, #tpu.memory_space<vmem>>, %arg9: memref<1x32xf32, #tpu.memory_space<vmem>>, %arg10: memref<1x32xf32, #tpu.memory_space<vmem>>) attributes {dimension_semantics = [#tpu.dimension_semantics<parallel>, #tpu.dimension_semantics<arbitrary>], iteration_bounds = array<i64: 2, 1>, scalar_prefetch = 0 : i64, scratch_operands = 2 : i64, tpu.core_type = #tpu.core_type<tc>, window_params = [{transform_indices = @transform_0, window_bounds = array<i64: 1, 32, 256>}, {transform_indices = @transform_1, window_bounds = array<i64: 1, 32, 256>}, {pipeline_mode = #tpu.pipeline_mode<synchronous>, transform_indices = @transform_2, window_bounds = array<i64: 64, 4>}, {pipeline_mode = #tpu.pipeline_mode<synchronous>, transform_indices = @transform_3, window_bounds = array<i64: 1, 4>}, {pipeline_mode = #tpu.pipeline_mode<synchronous>, transform_indices = @transform_4, window_bounds = array<i64: 4, 64>}, {pipeline_mode = #tpu.pipeline_mode<synchronous>, transform_indices = @transform_5, window_bounds = array<i64: 1, 64>}, {transform_indices = @transform_6, window_bounds = array<i64: 1, 1, 64>}]} {
    %c0_i32 = arith.constant 0 : i32
    %0 = arith.cmpi eq, %arg1, %c0_i32 : i32
    %1 = arith.extui %0 : i1 to i32
    %c0_i32_0 = arith.constant 0 : i32
    %2 = arith.cmpi ne, %1, %c0_i32_0 : i32
    scf.if %2 {
      %cst_17 = arith.constant 0.000000e+00 : f32
      %16 = vector.broadcast %cst_17 : f32 to vector<1x32xf32>
      %c0_18 = arith.constant 0 : index
      %c0_19 = arith.constant 0 : index
      %17 = vector.load %arg9[%c0_18, %c0_19] : memref<1x32xf32, #tpu.memory_space<vmem>>, vector<1x32xf32>
      tpu.vector_store %arg9[%c0_18, %c0_19], %16 {strides = array<i32>} : memref<1x32xf32, #tpu.memory_space<vmem>>, vector<1x32xf32>,
      %cst_20 = arith.constant 0.000000e+00 : f32
      %18 = vector.broadcast %cst_20 : f32 to vector<1x32xf32>
      %c0_21 = arith.constant 0 : index
      %c0_22 = arith.constant 0 : index
      %19 = vector.load %arg10[%c0_21, %c0_22] : memref<1x32xf32, #tpu.memory_space<vmem>>, vector<1x32xf32>
      tpu.vector_store %arg10[%c0_21, %c0_22], %18 {strides = array<i32>} : memref<1x32xf32, #tpu.memory_space<vmem>>, vector<1x32xf32>,
    } else {
    }
    %c0 = arith.constant 0 : index
    %c0_1 = arith.constant 0 : index
    %3 = vector.load %arg9[%c0, %c0_1] : memref<1x32xf32, #tpu.memory_space<vmem>>, vector<1x32xf32>
    %c0_2 = arith.constant 0 : index
    %c0_3 = arith.constant 0 : index
    %c0_4 = arith.constant 0 : index
    %4 = vector.load %arg2[%c0_2, %c0_3, %c0_4] : memref<1x32x256xf32, #tpu.memory_space<vmem>>, vector<1x32x256xf32>
    %cst = arith.constant dense<0.000000e+00> : vector<1x32xf32>
    %5 = vector.multi_reduction <add>, %4, %cst [2] : vector<1x32x256xf32> to vector<1x32xf32>
    %6 = arith.addf %3, %5 : vector<1x32xf32>
    %c0_5 = arith.constant 0 : index
    %c0_6 = arith.constant 0 : index
    %7 = vector.load %arg9[%c0_5, %c0_6] : memref<1x32xf32, #tpu.memory_space<vmem>>, vector<1x32xf32>
    tpu.vector_store %arg9[%c0_5, %c0_6], %6 {strides = array<i32>} : memref<1x32xf32, #tpu.memory_space<vmem>>, vector<1x32xf32>,
    %c0_7 = arith.constant 0 : index
    %c0_8 = arith.constant 0 : index
    %8 = vector.load %arg10[%c0_7, %c0_8] : memref<1x32xf32, #tpu.memory_space<vmem>>, vector<1x32xf32>
    %c0_9 = arith.constant 0 : index
    %c0_10 = arith.constant 0 : index
    %c0_11 = arith.constant 0 : index
    %9 = vector.load %arg3[%c0_9, %c0_10, %c0_11] : memref<1x32x256xf32, #tpu.memory_space<vmem>>, vector<1x32x256xf32>
    %cst_12 = arith.constant dense<0.000000e+00> : vector<1x32xf32>
    %10 = vector.multi_reduction <add>, %9, %cst_12 [2] : vector<1x32x256xf32> to vector<1x32xf32>
    %11 = arith.addf %8, %10 : vector<1x32xf32>
    %c0_13 = arith.constant 0 : index
    %c0_14 = arith.constant 0 : index
    %12 = vector.load %arg10[%c0_13, %c0_14] : memref<1x32xf32, #tpu.memory_space<vmem>>, vector<1x32xf32>
    tpu.vector_store %arg10[%c0_13, %c0_14], %11 {strides = array<i32>} : memref<1x32xf32, #tpu.memory_space<vmem>>, vector<1x32xf32>,
    %c0_i32_15 = arith.constant 0 : i32
    %13 = arith.cmpi eq, %arg1, %c0_i32_15 : i32
    %14 = arith.extui %13 : i1 to i32
    %c0_i32_16 = arith.constant 0 : i32
    %15 = arith.cmpi ne, %14, %c0_i32_16 : i32
    scf.if %15 {
      %c0_17 = arith.constant 0 : index
      %c0_18 = arith.constant 0 : index
      %16 = vector.load %arg9[%c0_17, %c0_18] : memref<1x32xf32, #tpu.memory_space<vmem>>, vector<1x32xf32>
      %cst_19 = arith.constant 3.906250e-03 : f32
      %17 = vector.broadcast %cst_19 : f32 to vector<1x32xf32>
      %18 = arith.mulf %16, %17 : vector<1x32xf32>
      %c0_20 = arith.constant 0 : index
      %c0_21 = arith.constant 0 : index
      %19 = vector.load %arg10[%c0_20, %c0_21] : memref<1x32xf32, #tpu.memory_space<vmem>>, vector<1x32xf32>
      %cst_22 = arith.constant 3.906250e-03 : f32
      %20 = vector.broadcast %cst_22 : f32 to vector<1x32xf32>
      %21 = arith.mulf %19, %20 : vector<1x32xf32>
      %c0_23 = arith.constant 0 : index
      %c0_24 = arith.constant 0 : index
      %22 = vector.load %arg4[%c0_23, %c0_24] : memref<64x4xf32, #tpu.memory_space<vmem>>, vector<32x4xf32>
      %cst_25 = arith.constant dense<0.000000e+00> : vector<1x4xf32>
      %23 = tpu.matmul %18, %22, %cst_25 {dimension_numbers = #tpu.dot_dimension_numbers<[1], [0], [0], [1], [0, 0, 1, 1], [], []>} : vector<1x32xf32>, vector<32x4xf32>, vector<1x4xf32> -> vector<1x4xf32>
      %c32 = arith.constant 32 : index
      %c0_26 = arith.constant 0 : index
      %24 = vector.load %arg4[%c32, %c0_26] : memref<64x4xf32, #tpu.memory_space<vmem>>, vector<32x4xf32>
      %cst_27 = arith.constant dense<0.000000e+00> : vector<1x4xf32>
      %25 = tpu.matmul %21, %24, %cst_27 {dimension_numbers = #tpu.dot_dimension_numbers<[1], [0], [0], [1], [0, 0, 1, 1], [], []>} : vector<1x32xf32>, vector<32x4xf32>, vector<1x4xf32> -> vector<1x4xf32>
      %26 = arith.addf %23, %25 : vector<1x4xf32>
      %c0_28 = arith.constant 0 : index
      %c0_29 = arith.constant 0 : index
      %27 = vector.load %arg5[%c0_28, %c0_29] : memref<1x4xf32, #tpu.memory_space<vmem>>, vector<1x4xf32>
      %28 = arith.addf %26, %27 : vector<1x4xf32>
      %cst_30 = arith.constant 0.000000e+00 : f32
      %29 = vector.broadcast %cst_30 : f32 to vector<1x4xf32>
      %30 = arith.maximumf %28, %29 : vector<1x4xf32>
      %c0_31 = arith.constant 0 : index
      %c0_32 = arith.constant 0 : index
      %31 = vector.load %arg6[%c0_31, %c0_32] : memref<4x64xf32, #tpu.memory_space<vmem>>, vector<4x64xf32>
      %cst_33 = arith.constant dense<0.000000e+00> : vector<1x64xf32>
      %32 = tpu.matmul %30, %31, %cst_33 {dimension_numbers = #tpu.dot_dimension_numbers<[1], [0], [0], [1], [0, 0, 1, 1], [], []>} : vector<1x4xf32>, vector<4x64xf32>, vector<1x64xf32> -> vector<1x64xf32>
      %c0_34 = arith.constant 0 : index
      %c0_35 = arith.constant 0 : index
      %33 = vector.load %arg7[%c0_34, %c0_35] : memref<1x64xf32, #tpu.memory_space<vmem>>, vector<1x64xf32>
      %34 = arith.addf %32, %33 : vector<1x64xf32>
      %35 = arith.negf %34 : vector<1x64xf32>
      %36 = math.exp %35 : vector<1x64xf32>
      %cst_36 = arith.constant 1.000000e+00 : f32
      %37 = vector.broadcast %cst_36 : f32 to vector<1x64xf32>
      %38 = arith.addf %37, %36 : vector<1x64xf32>
      %39 = arith.divf %37, %38 : vector<1x64xf32>
      %40 = vector.shape_cast %39 : vector<1x64xf32> to vector<1x1x64xf32>
      %c0_37 = arith.constant 0 : index
      %c0_38 = arith.constant 0 : index
      %c0_39 = arith.constant 0 : index
      %41 = vector.load %arg8[%c0_37, %c0_38, %c0_39] : memref<1x1x64xf32, #tpu.memory_space<vmem>>, vector<1x1x64xf32>
      tpu.vector_store %arg8[%c0_37, %c0_38, %c0_39], %40 {strides = array<i32>} : memref<1x1x64xf32, #tpu.memory_space<vmem>>, vector<1x1x64xf32>,
    } else {
    }
    return
  }
  func.func @transform_0(%arg0: i32, %arg1: i32) -> (i32, i32, i32) {
    %c0_i32 = arith.constant 0 : i32
    %c0_i32_0 = arith.constant 0 : i32
    return %arg0, %c0_i32, %arg1 : i32, i32, i32
  }
  func.func @transform_1(%arg0: i32, %arg1: i32) -> (i32, i32, i32) {
    %c0_i32 = arith.constant 0 : i32
    %c0_i32_0 = arith.constant 0 : i32
    return %arg0, %c0_i32, %arg1 : i32, i32, i32
  }
  func.func @transform_2(%arg0: i32, %arg1: i32) -> (i32, i32) {
    %c0_i32 = arith.constant 0 : i32
    %c0_i32_0 = arith.constant 0 : i32
    %c0_i32_1 = arith.constant 0 : i32
    return %c0_i32, %c0_i32_0 : i32, i32
  }
  func.func @transform_3(%arg0: i32, %arg1: i32) -> (i32, i32) {
    %c0_i32 = arith.constant 0 : i32
    %c0_i32_0 = arith.constant 0 : i32
    %c0_i32_1 = arith.constant 0 : i32
    return %c0_i32, %c0_i32_0 : i32, i32
  }
  func.func @transform_4(%arg0: i32, %arg1: i32) -> (i32, i32) {
    %c0_i32 = arith.constant 0 : i32
    %c0_i32_0 = arith.constant 0 : i32
    %c0_i32_1 = arith.constant 0 : i32
    return %c0_i32, %c0_i32_0 : i32, i32
  }
  func.func @transform_5(%arg0: i32, %arg1: i32) -> (i32, i32) {
    %c0_i32 = arith.constant 0 : i32
    %c0_i32_0 = arith.constant 0 : i32
    %c0_i32_1 = arith.constant 0 : i32
    return %c0_i32, %c0_i32_0 : i32, i32
  }
  func.func @transform_6(%arg0: i32, %arg1: i32) -> (i32, i32, i32) {
    %c0_i32 = arith.constant 0 : i32
    %c0_i32_0 = arith.constant 0 : i32
    %c0_i32_1 = arith.constant 0 : i32
    return %arg0, %c0_i32, %c0_i32_0 : i32, i32, i32
  }
}

module attributes {stable_mosaic.version = 11 : i64} {
  func.func @_scale_kernel(%arg0: i32, %arg1: i32, %arg2: memref<1x64x1xf32, #tpu.memory_space<vmem>>, %arg3: memref<1x32x256xf32, #tpu.memory_space<vmem>>, %arg4: memref<1x32x256xf32, #tpu.memory_space<vmem>>, %arg5: memref<1x64x256xf32, #tpu.memory_space<vmem>>) attributes {dimension_semantics = [#tpu.dimension_semantics<parallel>, #tpu.dimension_semantics<parallel>], iteration_bounds = array<i64: 2, 1>, scalar_prefetch = 0 : i64, scratch_operands = 0 : i64, tpu.core_type = #tpu.core_type<tc>, window_params = [{transform_indices = @transform_0, window_bounds = array<i64: 1, 64, 1>}, {transform_indices = @transform_1, window_bounds = array<i64: 1, 32, 256>}, {transform_indices = @transform_2, window_bounds = array<i64: 1, 32, 256>}, {transform_indices = @transform_3, window_bounds = array<i64: 1, 64, 256>}]} {
    %c0 = arith.constant 0 : index
    %c0_0 = arith.constant 0 : index
    %c0_1 = arith.constant 0 : index
    %0 = vector.load %arg2[%c0, %c0_0, %c0_1] : memref<1x64x1xf32, #tpu.memory_space<vmem>>, vector<1x64x1xf32>
    %1 = vector.extract_strided_slice %0 {offsets = [0, 0, 0], sizes = [1, 32, 1], strides = [1, 1, 1]} : vector<1x64x1xf32> to vector<1x32x1xf32>
    %2 = vector.extract_strided_slice %0 {offsets = [0, 32, 0], sizes = [1, 32, 1], strides = [1, 1, 1]} : vector<1x64x1xf32> to vector<1x32x1xf32>
    %c0_2 = arith.constant 0 : index
    %c0_3 = arith.constant 0 : index
    %c0_4 = arith.constant 0 : index
    %3 = vector.load %arg3[%c0_2, %c0_3, %c0_4] : memref<1x32x256xf32, #tpu.memory_space<vmem>>, vector<1x32x256xf32>
    %c0_5 = arith.constant 0 : index
    %c0_6 = arith.constant 0 : index
    %c0_7 = arith.constant 0 : index
    %4 = vector.load %arg4[%c0_5, %c0_6, %c0_7] : memref<1x32x256xf32, #tpu.memory_space<vmem>>, vector<1x32x256xf32>
    %5 = vector.broadcast %1 : vector<1x32x1xf32> to vector<1x32x256xf32>
    %6 = arith.mulf %3, %5 : vector<1x32x256xf32>
    %c0_8 = arith.constant 0 : index
    %c0_9 = arith.constant 0 : index
    %c0_10 = arith.constant 0 : index
    %7 = vector.load %arg5[%c0_8, %c0_9, %c0_10] : memref<1x64x256xf32, #tpu.memory_space<vmem>>, vector<1x32x256xf32>
    tpu.vector_store %arg5[%c0_8, %c0_9, %c0_10], %6 {strides = array<i32>} : memref<1x64x256xf32, #tpu.memory_space<vmem>>, vector<1x32x256xf32>,
    %8 = vector.broadcast %2 : vector<1x32x1xf32> to vector<1x32x256xf32>
    %9 = arith.mulf %4, %8 : vector<1x32x256xf32>
    %c0_11 = arith.constant 0 : index
    %c32 = arith.constant 32 : index
    %c0_12 = arith.constant 0 : index
    %10 = vector.load %arg5[%c0_11, %c32, %c0_12] : memref<1x64x256xf32, #tpu.memory_space<vmem>>, vector<1x32x256xf32>
    tpu.vector_store %arg5[%c0_11, %c32, %c0_12], %9 {strides = array<i32>} : memref<1x64x256xf32, #tpu.memory_space<vmem>>, vector<1x32x256xf32>,
    return
  }
  func.func @transform_0(%arg0: i32, %arg1: i32) -> (i32, i32, i32) {
    %c0_i32 = arith.constant 0 : i32
    %c0_i32_0 = arith.constant 0 : i32
    %c0_i32_1 = arith.constant 0 : i32
    return %arg0, %c0_i32, %c0_i32_0 : i32, i32, i32
  }
  func.func @transform_1(%arg0: i32, %arg1: i32) -> (i32, i32, i32) {
    %c0_i32 = arith.constant 0 : i32
    %c0_i32_0 = arith.constant 0 : i32
    return %arg0, %c0_i32, %arg1 : i32, i32, i32
  }
  func.func @transform_2(%arg0: i32, %arg1: i32) -> (i32, i32, i32) {
    %c0_i32 = arith.constant 0 : i32
    %c0_i32_0 = arith.constant 0 : i32
    return %arg0, %c0_i32, %arg1 : i32, i32, i32
  }
  func.func @transform_3(%arg0: i32, %arg1: i32) -> (i32, i32, i32) {
    %c0_i32 = arith.constant 0 : i32
    %c0_i32_0 = arith.constant 0 : i32
    return %arg0, %c0_i32, %arg1 : i32, i32, i32
  }
}

</mosaic_0001>

<bundles_post_ra>
// kernel: caff_forward.3
= control target key start
LH: loop header
LB: loop body
LE: loop exit
PB: predicated region body
PF: predicated region fallthrough
CT: control target
= control target key end

     0   :  { %s570_s12 = smov 0   ;;  %s572_s13 = smov 0   ;;  %s632_s0 = inlined_call_operand.vmem [shape: f32[2,64,1], index: 0, kind: input, shape index: {}]   ;;  %s633_s1 = inlined_call_operand.vmem [shape: f32[2,32,256], index: 1, kind: input, shape index: {}]   ;;  %s634_s2 = inlined_call_operand.vmem [shape: f32[2,32,256], index: 2, kind: input, shape index: {}]   ;;  %s635_s3 = inlined_call_operand.vmem [shape: f32[2,64,256], index: 3, kind: output, shape index: {}]  }
   0x1   :  { %s574_s14 = smov 0  }
   0x2 LB: > { %s25_s15 = sadd.s32 1, %s543_s13  ;;  %p483_p0 = scmp.ge.s32.totalorder %s547_s14, 1  ;;  %s547_s14 = sphi %s574_s14, %s13_s14   ;;  %s543_s13 = sphi %s572_s13, %s637_s13   ;;  %s539_s12 = sphi %s570_s12, %s636_s12  }
   0x3   : > { %p27_p1 = scmp.ge.s32.totalorder %s25_s15, 2  ;;  %p185_p2 = scmp.lt.s32.totalorder %s547_s14, 3 }
   0x5   : > { %s639_s15 = smov (%p27_p1, %s25_s15), 0  ;;  %p186_p3 = pnand %p483_p0, %p185_p2 }
   0x6   : > { %p231_p4 = scmp.lt.s32.totalorder (!%p186_p3), %s539_s12, 1 }
   0x7   : > { %189 = sbr.rel (%p186_p3) target bundleno = 156 (0x9c), region = 32 }
   0xc   : > { %v549_v0 = vmov 0   ;;  %s641_s12 = smov (!%p231_p4, %s539_s12), 1 }
   0xd   : > { %524 = vset.pattern.permute.xlu1 %v549_v0  ;;  %523 = vset.pattern.permute.xlu0 %v549_v0  ;;  %s588_s16 = sshll.u32 %s641_s12, 6  ;;  %s497_s23 = sshll.u32 %s641_s12, 7 }
   0xe   : > { %s235_s19 = scalar_lea.vmem %s632_s0, %s588_s16  ;;  %s244_s22 = scalar_lea.vmem %s633_s1, %s588_s16 }
   0xf   : > { %v268_v1 = vld [vmem:[%s235_s19 + $0x10] sm:$0xff]  ;;  %v266_v2 = vld [vmem:[%s235_s19] sm:$0xff]  ;;  %v269_v3 = vld [vmem:[%s235_s19 + $0x18] sm:$0xff]  ;;  %s601_s26 = scalar_lea.vmem %s635_s3, %s497_s23  ;;  %s254_s29 = scalar_lea.vmem %s634_s2, %s588_s16 }
  0x10   : > { %302 = vperm.xlu1 %524, %v268_v1   ;;  %292 = vperm.xlu0 %523, %v266_v2   ;;  %v267_v4 = vld [vmem:[%s235_s19 + $0x8] sm:$0xff]  ;;  %v270_v6 = vld [vmem:[%s235_s19 + $0x20] sm:$0xff]  ;;  %v273_v7 = vld [vmem:[%s235_s19 + $0x38] sm:$0xff] }
  0x11   : > { %v271_v5 = vld [vmem:[%s235_s19 + $0x28] sm:$0xff]  ;;  %v272_v8 = vld [vmem:[%s235_s19 + $0x30] sm:$0xff]  ;;  %v278_v9 = vld [vmem:[%s244_s22 + $0x20] sm:$0xff] }
  0x12   : > { %v279_v10 = vld [vmem:[%s244_s22 + $0x28] sm:$0xff]  ;;  %v274_v11 = vld [vmem:[%s244_s22] sm:$0xff]  ;;  %v280_v19 = vld [vmem:[%s244_s22 + $0x30] sm:$0xff] }
  0x13   : > { %v275_v12 = vld [vmem:[%s244_s22 + $0x8] sm:$0xff]  ;;  %v281_v20 = vld [vmem:[%s244_s22 + $0x38] sm:$0xff]  ;;  %v276_v21 = vld [vmem:[%s244_s22 + $0x10] sm:$0xff] }
  0x14   : > { %307 = vperm.xlu1 %524, %v269_v3   ;;  %297 = vperm.xlu0 %523, %v267_v4   ;;  %v277_v22 = vld [vmem:[%s244_s22 + $0x18] sm:$0xff]  ;;  %v284_v29 = vld [vmem:[%s254_s29 + $0x10] sm:$0xff]  ;;  %v282_v31 = vld [vmem:[%s254_s29] sm:$0xff] }
  0x15   : > { %v285_v30 = vld [vmem:[%s254_s29 + $0x18] sm:$0xff]  ;;  %v283_v32 = vld [vmem:[%s254_s29 + $0x8] sm:$0xff]  ;;  %v288_v39 = vld [vmem:[%s254_s29 + $0x30] sm:$0xff] }
  0x16   : > { %v289_v40 = vld [vmem:[%s254_s29 + $0x38] sm:$0xff]  ;;  %v286_v41 = vld [vmem:[%s254_s29 + $0x20] sm:$0xff]  ;;  %v287_v42 = vld [vmem:[%s254_s29 + $0x28] sm:$0xff] }
  0x18   : > { %333 = vperm.xlu1 %524, %v271_v5   ;;  %328 = vperm.xlu0 %523, %v270_v6  }
  0x1c   : > { %343 = vperm.xlu1 %524, %v273_v7   ;;  %338 = vperm.xlu0 %523, %v272_v8  }
  0x8b   : > { %v303_v13 = vpop.permute.xlu1 %302  ;;  %v293_v14 = vpop.permute.xlu0 %292 }
  0x8c   : > { %v314_v15 = vmul.f32 %v303_v13, %v278_v9  ;;  %v315_v16 = vmul.f32 %v303_v13, %v279_v10  ;;  %v310_v17 = vmul.f32 %v293_v14, %v274_v11  ;;  %v311_v18 = vmul.f32 %v293_v14, %v275_v12 }
  0x8e   : > { %322 = vst [vmem:[%s601_s26 + $0x20] sm:$0xff] %v314_v15  ;;  %323 = vst [vmem:[%s601_s26 + $0x28] sm:$0xff] %v315_v16 }
  0x8f   : > { %318 = vst [vmem:[%s601_s26] sm:$0xff] %v310_v17  ;;  %319 = vst [vmem:[%s601_s26 + $0x8] sm:$0xff] %v311_v18  ;;  %v308_v23 = vpop.permute.xlu1 %307  ;;  %v298_v24 = vpop.permute.xlu0 %297 }
  0x90   : > { %v316_v25 = vmul.f32 %v308_v23, %v280_v19  ;;  %v317_v26 = vmul.f32 %v308_v23, %v281_v20  ;;  %v312_v27 = vmul.f32 %v298_v24, %v276_v21  ;;  %v313_v28 = vmul.f32 %v298_v24, %v277_v22 }
  0x92   : > { %324 = vst [vmem:[%s601_s26 + $0x30] sm:$0xff] %v316_v25  ;;  %325 = vst [vmem:[%s601_s26 + $0x38] sm:$0xff] %v317_v26 }
  0x93   : > { %320 = vst [vmem:[%s601_s26 + $0x10] sm:$0xff] %v312_v27  ;;  %321 = vst [vmem:[%s601_s26 + $0x18] sm:$0xff] %v313_v28  ;;  %v334_v33 = vpop.permute.xlu1 %333  ;;  %v329_v34 = vpop.permute.xlu0 %328 }
  0x94   : > { %v348_v35 = vmul.f32 %v334_v33, %v284_v29  ;;  %v349_v36 = vmul.f32 %v334_v33, %v285_v30  ;;  %v346_v37 = vmul.f32 %v329_v34, %v282_v31  ;;  %v347_v38 = vmul.f32 %v329_v34, %v283_v32 }
  0x96   : > { %356 = vst [vmem:[%s601_s26 + $0x50] sm:$0xff] %v348_v35  ;;  %357 = vst [vmem:[%s601_s26 + $0x58] sm:$0xff] %v349_v36 }
  0x97   : > { %354 = vst [vmem:[%s601_s26 + $0x40] sm:$0xff] %v346_v37  ;;  %355 = vst [vmem:[%s601_s26 + $0x48] sm:$0xff] %v347_v38  ;;  %v344_v43 = vpop.permute.xlu1 %343  ;;  %v339_v44 = vpop.permute.xlu0 %338 }
  0x98   : > { %v352_v45 = vmul.f32 %v344_v43, %v288_v39  ;;  %v353_v46 = vmul.f32 %v344_v43, %v289_v40  ;;  %v350_v47 = vmul.f32 %v339_v44, %v286_v41  ;;  %v351_v48 = vmul.f32 %v339_v44, %v287_v42 }
  0x9a   : > { %360 = vst [vmem:[%s601_s26 + $0x70] sm:$0xff] %v352_v45  ;;  %361 = vst [vmem:[%s601_s26 + $0x78] sm:$0xff] %v353_v46 }
  0x9b   : > { %358 = vst [vmem:[%s601_s26 + $0x60] sm:$0xff] %v350_v47  ;;  %359 = vst [vmem:[%s601_s26 + $0x68] sm:$0xff] %v351_v48 }
  0x9c PF: > { %s13_s14 = sadd.s32 1, %s547_s14   ;;  %s636_s12 = smov %s543_s13 }
  0x9d   : > { %p10_p5 = scmp.ge.s32.totalorder %s13_s14, 4   ;;  %s637_s13 = smov %s639_s15 }
  0x9f   :  { %12 = sbr.rel (!%p10_p5) target bundleno = 2 (0x2), region = 68 }

// kernel: caff_forward.2
= control target key start
LH: loop header
LB: loop body
LE: loop exit
PB: predicated region body
PF: predicated region fallthrough
CT: control target
= control target key end

     0   :  { %s1608_s21 = smov 0   ;;  %s1610_s22 = smov 0   ;;  %s1859_s0 = inlined_call_operand.vmem [shape: f32[2,32,256], index: 0, kind: input, shape index: {}]   ;;  %s1860_s1 = inlined_call_operand.vmem [shape: f32[2,32,256], index: 1, kind: input, shape index: {}]   ;;  %s1861_s2 = inlined_call_operand.vmem [shape: f32[64,4], index: 2, kind: input, shape index: {}]   ;;  %s1862_s3 = inlined_call_operand.vmem [shape: f32[1,4], index: 3, kind: input, shape index: {}]   ;;  %s1863_s4 = inlined_call_operand.vmem [shape: f32[4,64], index: 4, kind: input, shape index: {}]   ;;  %s1864_s5 = inlined_call_operand.vmem [shape: f32[1,64], index: 5, kind: input, shape index: {}]   ;;  %s1865_s6 = inlined_call_operand.vmem [shape: f32[2,1,64], index: 6, kind: output, shape index: {}]  }
   0x1   :  { %s1612_s23 = smov 0  }
   0x2 LB: > { %s28_s24 = sadd.s32 1, %s1563_s22  ;;  %p1458_p0 = scmp.ge.s32.totalorder %s1567_s23, 1  ;;  %s1567_s23 = sphi %s1612_s23, %s16_s23   ;;  %s1563_s22 = sphi %s1610_s22, %s1867_s22   ;;  %s1559_s21 = sphi %s1608_s21, %s1866_s21  }
   0x3   : > { %p30_p1 = scmp.ge.s32.totalorder %s28_s24, 2  ;;  %p248_p2 = scmp.lt.s32.totalorder %s1567_s23, 3 }
   0x5   : > { %s1869_s24 = smov (%p30_p1, %s28_s24), 0  ;;  %p249_p3 = pnand %p1458_p0, %p248_p2 }
   0x6   : > { %p290_p4 = scmp.lt.s32.totalorder (!%p249_p3), %s1559_s21, 1 }
   0x7   : > { %252 = sbr.rel (%p249_p3) target bundleno = 775 (0x307), region = 44 }
   0xc   : > { %s1871_s21 = smov (!%p290_p4, %s1559_s21), 1  ;;  %v1569_v24 = vmov 0   ;;  %v344_v25 = vlaneseq  ;;  %v1570_v26 = vmov 1966171168   ;;  %vm316_vm0 = vcmask 253952  }
   0xd   : > { %s1470_s25 = sshll.u32 %s1871_s21, 6  ;;  %1539 = vset.pattern.permute.xlu0 %v1569_v24  ;;  %1540 = vset.pattern.permute.xlu1 %v1569_v24  ;;  %v477_v27 = vunpack.c.l.s4 %v1570_v26  ;;  %vm1572_vm1 = vmmov 0   ;;  %vm691_vm2 = vcmask 130112   ;;  %vm698_vm3 = vcmask 195712   ;;  %s311_s12 = scalar_lea.vmem %s1865_s6, %s1871_s21 }
   0xe   : > { %s297_s28 = scalar_lea.vmem %s1859_s0, %s1470_s25  ;;  %s307_s7 = scalar_lea.vmem %s1860_s1, %s1470_s25  ;;  %v1636_v28 = vshrl.u32 %v344_v25, 7  ;;  %vm705_vm4 = vcmask 261312   ;;  %vm1137_vm5 = vcmask 261120   ;;  %vm1293_vm6 = vcmask 1043456  }
   0xf   : > { %v320_v0 = vld [vmem:[%s297_s28] sm:$0xff]  ;;  %v321_v1 = vld [vmem:[%s297_s28 + $0x8] sm:$0xff]  ;;  %v322_v2 = vld [vmem:[%s297_s28 + $0x10] sm:$0xff]  ;;  %v478_v29 = vunpack.c.0.s8 %v477_v27  ;;  %vm1289_vm7 = vcmask 31744   ;;  %vm1373_vm8 = vcmask 516096  }
  0x10   : > { %v328_v3 = vadd.f32 %v321_v1, %v320_v0  ;;  %v323_v4 = vld [vmem:[%s297_s28 + $0x18] sm:$0xff]  ;;  %v726_v5 = vld [vmem:[%s307_s7] sm:$0xff]  ;;  %v727_v6 = vld [vmem:[%s307_s7 + $0x8] sm:$0xff]  ;;  %v1639_v30 = vsub.s32 0, %v1636_v28  ;;  %v1642_v31 = vsub.s32 1, %v1636_v28  ;;  %v1645_v32 = vsub.s32 2, %v1636_v28 }
  0x11   : > { %v734_v7 = vadd.f32 %v727_v6, %v726_v5  ;;  %v728_v8 = vld [vmem:[%s307_s7 + $0x10] sm:$0xff]  ;;  %v729_v9 = vld [vmem:[%s307_s7 + $0x18] sm:$0xff]  ;;  %v331_v10 = vadd.f32 %v323_v4, %v322_v2  ;;  %v324_v12 = vld [vmem:[%s297_s28 + $0x20] sm:$0xff]  ;;  %v1648_v33 = vsub.s32 3, %v1636_v28  ;;  %v1651_v34 = vsub.s32 4, %v1636_v28 }
  0x12   : > { %329 = vadd.xlane.f32.xlu0 %v328_v3  ;;  %v737_v11 = vadd.f32 %v729_v9, %v728_v8  ;;  %v325_v13 = vld [vmem:[%s297_s28 + $0x28] sm:$0xff]  ;;  %v730_v14 = vld [vmem:[%s307_s7 + $0x20] sm:$0xff]  ;;  %v326_v18 = vld [vmem:[%s297_s28 + $0x30] sm:$0xff]  ;;  %v1654_v35 = vsub.s32 5, %v1636_v28  ;;  %v1657_v36 = vsub.s32 6, %v1636_v28  ;;  %v1660_v37 = vsub.s32 7, %v1636_v28 }
  0x13   : > { %735 = vadd.xlane.f32.xlu1 %v734_v7  ;;  %v731_v15 = vld [vmem:[%s307_s7 + $0x28] sm:$0xff]  ;;  %v334_v16 = vadd.f32 %v325_v13, %v324_v12  ;;  %v327_v19 = vld [vmem:[%s297_s28 + $0x38] sm:$0xff]  ;;  %v732_v20 = vld [vmem:[%s307_s7 + $0x30] sm:$0xff]  ;;  %v1663_v39 = vsub.s32 %v478_v29, %v1636_v28 }
  0x14   : > { %v740_v17 = vadd.f32 %v731_v15, %v730_v14  ;;  %v733_v21 = vld [vmem:[%s307_s7 + $0x38] sm:$0xff]  ;;  %v337_v22 = vadd.f32 %v327_v19, %v326_v18 }
  0x15   : > { %v743_v23 = vadd.f32 %v733_v21, %v732_v20 }
  0x16   : > { %332 = vadd.xlane.f32.xlu0 %v331_v10 }
  0x17   : > { %738 = vadd.xlane.f32.xlu1 %v737_v11 }
  0x1a   : > { %335 = vadd.xlane.f32.xlu0 %v334_v16 }
  0x1b   : > { %741 = vadd.xlane.f32.xlu1 %v740_v17 }
  0x1e   : > { %338 = vadd.xlane.f32.xlu0 %v337_v22 }
  0x1f   : > { %744 = vadd.xlane.f32.xlu1 %v743_v23 }
  0x9b   : > { %v330_v38 = vpop.xlane.xlu0 %329 }
  0x9c   : > { %v736_v40 = vpop.xlane.xlu1 %735  ;;  %v347_v41 = vrot.slane %v330_v38, %v1639_v30  ;;  %v351_v42 = vrot.slane %v330_v38, %v1642_v31  ;;  %v355_v43 = vrot.slane %v330_v38, %v1645_v32  ;;  %v359_v44 = vrot.slane %v330_v38, %v1648_v33 }
  0x9d   : > { %v363_v45 = vrot.slane %v330_v38, %v1651_v34  ;;  %v367_v46 = vrot.slane %v330_v38, %v1654_v35  ;;  %v371_v47 = vrot.slane %v330_v38, %v1657_v36  ;;  %v375_v48 = vrot.slane %v330_v38, %v1660_v37 }
  0x9e   : > { %v472_v49 = vcombine.low %v347_v41, %v351_v42  ;;  %v473_v50 = vcombine.low %v355_v43, %v359_v44  ;;  %v753_v51 = vrot.slane %v736_v40, %v1639_v30  ;;  %v757_v52 = vrot.slane %v736_v40, %v1642_v31 }
  0x9f   : > { %v333_v53 = vpop.xlane.xlu0 %332  ;;  %v474_v54 = vcombine.low %v363_v45, %v367_v46  ;;  %v475_v55 = vcombine.low %v371_v47, %v375_v48  ;;  %v761_v56 = vrot.slane %v736_v40, %v1645_v32  ;;  %v765_v57 = vrot.slane %v736_v40, %v1648_v33 }
  0xa0   : > { %v482_v58 = vrot.slane %v472_v49, %v1663_v39  ;;  %v489_v59 = vrot.slane %v473_v50, %v1663_v39  ;;  %v379_v60 = vrot.slane %v333_v53, %v1639_v30  ;;  %v383_v61 = vrot.slane %v333_v53, %v1642_v31  ;;  %v739_v14 = vpop.xlane.xlu1 %738 }
  0xa1   : > { %v496_v62 = vrot.slane %v474_v54, %v1663_v39  ;;  %v503_v63 = vrot.slane %v475_v55, %v1663_v39  ;;  %v387_v0 = vrot.slane %v333_v53, %v1645_v32  ;;  %v391_v1 = vrot.slane %v333_v53, %v1648_v33 }
  0xa2   : > { %v504_v2 = vcombine.low %v482_v58, %v489_v59  ;;  %v395_v3 = vrot.slane %v333_v53, %v1651_v34  ;;  %v399_v4 = vrot.slane %v333_v53, %v1654_v35  ;;  %v403_v5 = vrot.slane %v333_v53, %v1657_v36 }
  0xa3   : > { %v505_v6 = vcombine.low %v496_v62, %v503_v63  ;;  %v407_v7 = vrot.slane %v333_v53, %v1660_v37  ;;  %v521_v8 = vcombine.low %v379_v60, %v383_v61  ;;  %v522_v9 = vcombine.low %v387_v0, %v391_v1  ;;  %v336_v50 = vpop.xlane.xlu0 %335 }
  0xa4   : > { %v512_v10 = vrot.slane %v504_v2, %v1663_v39  ;;  %v523_v11 = vcombine.low %v395_v3, %v399_v4  ;;  %v769_v12 = vrot.slane %v736_v40, %v1651_v34  ;;  %v773_v13 = vrot.slane %v736_v40, %v1654_v35  ;;  %v742_v3 = vpop.xlane.xlu1 %741 }
  0xa5   : > { %v519_v15 = vrot.slane %v505_v6, %v1663_v39  ;;  %v524_v16 = vcombine.low %v403_v5, %v407_v7  ;;  %v531_v17 = vrot.slane %v521_v8, %v1663_v39  ;;  %v538_v18 = vrot.slane %v522_v9, %v1663_v39 }
  0xa6   : > { %v545_v19 = vrot.slane %v523_v11, %v1663_v39  ;;  %v777_v20 = vrot.slane %v736_v40, %v1657_v36  ;;  %v781_v21 = vrot.slane %v736_v40, %v1660_v37  ;;  %v878_v22 = vcombine.low %v753_v51, %v757_v52 }
  0xa7   : > { %v520_v23 = vcombine.low %v512_v10, %v519_v15  ;;  %v552_v24 = vrot.slane %v524_v16, %v1663_v39  ;;  %v553_v26 = vcombine.low %v531_v17, %v538_v18  ;;  %v879_v27 = vcombine.low %v761_v56, %v765_v57 }
  0xa8   : > { %v880_v29 = vcombine.low %v769_v12, %v773_v13  ;;  %v881_v38 = vcombine.low %v777_v20, %v781_v21  ;;  %v888_v41 = vrot.slane %v878_v22, %v1663_v39  ;;  %v785_v42 = vrot.slane %v739_v14, %v1639_v30 }
  0xa9   : > { %669 = vperm.xlu0 %1539, %v520_v23   ;;  %v554_v43 = vcombine.low %v545_v19, %v552_v24  ;;  %v561_v44 = vrot.slane %v553_v26, %v1663_v39  ;;  %v895_v45 = vrot.slane %v879_v27, %v1663_v39  ;;  %v789_v40 = vrot.slane %v739_v14, %v1642_v31 }
  0xaa   : > { %v902_v46 = vrot.slane %v880_v29, %v1663_v39  ;;  %v909_v47 = vrot.slane %v881_v38, %v1663_v39  ;;  %v793_v48 = vrot.slane %v739_v14, %v1645_v32  ;;  %v797_v49 = vrot.slane %v739_v14, %v1648_v33  ;;  %v339_v38 = vpop.xlane.xlu0 %338 }
  0xab   : > { %v568_v51 = vrot.slane %v554_v43, %v1663_v39  ;;  %v910_v52 = vcombine.low %v888_v41, %v895_v45  ;;  %v801_v53 = vrot.slane %v739_v14, %v1651_v34  ;;  %v805_v54 = vrot.slane %v739_v14, %v1654_v35 }
  0xac   : > { %v911_v55 = vcombine.low %v902_v46, %v909_v47  ;;  %v809_v56 = vrot.slane %v739_v14, %v1657_v36  ;;  %v813_v57 = vrot.slane %v739_v14, %v1660_v37  ;;  %v927_v58 = vcombine.low %v785_v42, %v789_v40 }
  0xad   : > { %v569_v59 = vcombine.low %v561_v44, %v568_v51  ;;  %v918_v60 = vrot.slane %v910_v52, %v1663_v39  ;;  %v928_v61 = vcombine.low %v793_v48, %v797_v49  ;;  %v929_v62 = vcombine.low %v801_v53, %v805_v54 }
  0xae   : > { %v925_v63 = vrot.slane %v911_v55, %v1663_v39  ;;  %v930_v0 = vcombine.low %v809_v56, %v813_v57  ;;  %v937_v1 = vrot.slane %v927_v58, %v1663_v39  ;;  %v411_v2 = vrot.slane %v336_v50, %v1639_v30 }
  0xaf   : > { %672 = vperm.xlu1 %1540, %v569_v59   ;;  %v944_v4 = vrot.slane %v928_v61, %v1663_v39  ;;  %v951_v5 = vrot.slane %v929_v62, %v1663_v39  ;;  %v415_v6 = vrot.slane %v336_v50, %v1642_v31  ;;  %v419_v7 = vrot.slane %v336_v50, %v1645_v32 }
  0xb0   : > { %v926_v8 = vcombine.low %v918_v60, %v925_v63  ;;  %v958_v9 = vrot.slane %v930_v0, %v1663_v39  ;;  %v423_v10 = vrot.slane %v336_v50, %v1648_v33  ;;  %v427_v11 = vrot.slane %v336_v50, %v1651_v34  ;;  %v745_v60 = vpop.xlane.xlu1 %744 }
  0xb1   : > { %v959_v12 = vcombine.low %v937_v1, %v944_v4  ;;  %v431_v13 = vrot.slane %v336_v50, %v1654_v35  ;;  %v435_v14 = vrot.slane %v336_v50, %v1657_v36  ;;  %v439_v15 = vrot.slane %v336_v50, %v1660_v37 }
  0xb2   : > { %v960_v16 = vcombine.low %v951_v5, %v958_v9  ;;  %v570_v17 = vcombine.low %v411_v2, %v415_v6  ;;  %v571_v18 = vcombine.low %v419_v7, %v423_v10  ;;  %v817_v19 = vrot.slane %v742_v3, %v1639_v30 }
  0xb3   : > { %1075 = vperm.xlu1 %1540, %v926_v8   ;;  %v967_v20 = vrot.slane %v959_v12, %v1663_v39  ;;  %v572_v21 = vcombine.low %v427_v11, %v431_v13  ;;  %v573_v22 = vcombine.low %v435_v14, %v439_v15  ;;  %v821_v23 = vrot.slane %v742_v3, %v1642_v31 }
  0xb4   : > { %v974_v24 = vrot.slane %v960_v16, %v1663_v39  ;;  %v580_v26 = vrot.slane %v570_v17, %v1663_v39  ;;  %v587_v27 = vrot.slane %v571_v18, %v1663_v39  ;;  %v825_v29 = vrot.slane %v742_v3, %v1645_v32 }
  0xb5   : > { %v594_v41 = vrot.slane %v572_v21, %v1663_v39  ;;  %v601_v42 = vrot.slane %v573_v22, %v1663_v39  ;;  %v829_v43 = vrot.slane %v742_v3, %v1648_v33  ;;  %v833_v44 = vrot.slane %v742_v3, %v1651_v34 }
  0xb6   : > { %v975_v45 = vcombine.low %v967_v20, %v974_v24  ;;  %v602_v40 = vcombine.low %v580_v26, %v587_v27  ;;  %v837_v46 = vrot.slane %v742_v3, %v1654_v35  ;;  %v841_v47 = vrot.slane %v742_v3, %v1657_v36 }
  0xb7   : > { %v603_v48 = vcombine.low %v594_v41, %v601_v42  ;;  %v845_v49 = vrot.slane %v742_v3, %v1660_v37  ;;  %v976_v50 = vcombine.low %v817_v19, %v821_v23  ;;  %v977_v51 = vcombine.low %v825_v29, %v829_v43 }
  0xb8   : > { %1078 = vperm.xlu1 %1540, %v975_v45   ;;  %v610_v52 = vrot.slane %v602_v40, %v1663_v39  ;;  %v978_v53 = vcombine.low %v833_v44, %v837_v46  ;;  %v443_v54 = vrot.slane %v339_v38, %v1639_v30  ;;  %v447_v55 = vrot.slane %v339_v38, %v1642_v31 }
  0xb9   : > { %v617_v56 = vrot.slane %v603_v48, %v1663_v39  ;;  %v979_v57 = vcombine.low %v841_v47, %v845_v49  ;;  %v986_v58 = vrot.slane %v976_v50, %v1663_v39  ;;  %v993_v59 = vrot.slane %v977_v51, %v1663_v39  ;;  %v1132_v49 = vld [vmem:[%s1861_s2 + $0x18] sm:$0xff]  ;;  %v1131_v50 = vld [vmem:[%s1861_s2 + $0x10] sm:$0xff] }
  0xba   : > { %v1000_v61 = vrot.slane %v978_v53, %v1663_v39  ;;  %v451_v62 = vrot.slane %v339_v38, %v1645_v32  ;;  %v455_v63 = vrot.slane %v339_v38, %v1648_v33  ;;  %v459_v0 = vrot.slane %v339_v38, %v1651_v34  ;;  %v1136_v51 = vld [vmem:[%s1861_s2 + $0x38] sm:$0xff]  ;;  %v1135_v53 = vld [vmem:[%s1861_s2 + $0x30] sm:$0xff] }
  0xbb   : > { %v618_v1 = vcombine.low %v610_v52, %v617_v56  ;;  %v1007_v2 = vrot.slane %v979_v57, %v1663_v39  ;;  %v1008_v3 = vcombine.low %v986_v58, %v993_v59  ;;  %v463_v4 = vrot.slane %v339_v38, %v1654_v35  ;;  %v1130_v52 = vld [vmem:[%s1861_s2 + $0x8] sm:$0xff]  ;;  %v1133_v56 = vld [vmem:[%s1861_s2 + $0x20] sm:$0xff] }
  0xbc   : > { %v467_v5 = vrot.slane %v339_v38, %v1657_v36  ;;  %v471_v6 = vrot.slane %v339_v38, %v1660_v37  ;;  %v619_v7 = vcombine.low %v443_v54, %v447_v55  ;;  %v620_v8 = vcombine.low %v451_v62, %v455_v63  ;;  %v1129_v54 = vld [vmem:[%s1861_s2] sm:$0xff]  ;;  %v1134_v55 = vld [vmem:[%s1861_s2 + $0x28] sm:$0xff] }
  0xbd   : > { %675 = vperm.xlu1 %1540, %v618_v1   ;;  %v1009_v9 = vcombine.low %v1000_v61, %v1007_v2  ;;  %v1016_v10 = vrot.slane %v1008_v3, %v1663_v39  ;;  %v621_v11 = vcombine.low %v459_v0, %v463_v4  ;;  %v849_v12 = vrot.slane %v745_v60, %v1639_v30 }
  0xbe   : > { %v622_v13 = vcombine.low %v467_v5, %v471_v6  ;;  %v629_v14 = vrot.slane %v619_v7, %v1663_v39  ;;  %v636_v15 = vrot.slane %v620_v8, %v1663_v39  ;;  %v853_v16 = vrot.slane %v745_v60, %v1642_v31 }
  0xbf   : > { %v1023_v17 = vrot.slane %v1009_v9, %v1663_v39  ;;  %v643_v18 = vrot.slane %v621_v11, %v1663_v39  ;;  %v857_v19 = vrot.slane %v745_v60, %v1645_v32  ;;  %v861_v20 = vrot.slane %v745_v60, %v1648_v33 }
  0xc0   : > { %v650_v21 = vrot.slane %v622_v13, %v1663_v39  ;;  %v651_v22 = vcombine.low %v629_v14, %v636_v15  ;;  %v865_v30 = vrot.slane %v745_v60, %v1651_v34  ;;  %v869_v23 = vrot.slane %v745_v60, %v1654_v35 }
  0xc1   : > { %v1024_v24 = vcombine.low %v1016_v10, %v1023_v17  ;;  %v873_v26 = vrot.slane %v745_v60, %v1657_v36  ;;  %v877_v31 = vrot.slane %v745_v60, %v1660_v37  ;;  %v1025_v27 = vcombine.low %v849_v12, %v853_v16 }
  0xc2   : > { %v652_v29 = vcombine.low %v643_v18, %v650_v21  ;;  %v659_v38 = vrot.slane %v651_v22, %v1663_v39  ;;  %v1026_v41 = vcombine.low %v857_v19, %v861_v20  ;;  %v1027_v32 = vcombine.low %v865_v30, %v869_v23 }
  0xc3   : > { %1081 = vperm.xlu1 %1540, %v1024_v24   ;;  %v1028_v33 = vcombine.low %v873_v26, %v877_v31  ;;  %v1035_v42 = vrot.slane %v1025_v27, %v1663_v39  ;;  %v1571_v40 = vmov 0.0   ;;  %v681_v60 = vand.u32 127, %v344_v25 }
  0xc4   : > { %v666_v43 = vrot.slane %v652_v29, %v1663_v39  ;;  %v1042_v34 = vrot.slane %v1026_v41, %v1663_v39  ;;  %v1049_v35 = vrot.slane %v1027_v32, %v1663_v39  ;;  %317 = vst.msk [vmem:[#allocation2] sm:$0x1] %vm316_vm0, %v1571_v40  ;;  %318 = vst.msk [vmem:[#allocation3] sm:$0x1] %vm316_vm0, %v1571_v40  ;;  %1495 = vmatprep.subr.mxu1 %v1571_v40 }
  0xc5   : > { %v1056_v36 = vrot.slane %v1028_v33, %v1663_v39  ;;  %1484 = vmatprep.subr.mxu0 %v1571_v40  ;;  %1496 = vmatpush3.msra.mxu1 %v1132_v49  ;;  %v686_v61 = vadd.s32 4294967288, %v681_v60  ;;  %v693_v63 = vadd.s32 4294967280, %v681_v60  ;;  %v700_v1 = vadd.s32 4294967272, %v681_v60  ;;  %v1287_v33 = vld [vmem:[%s1863_s4] sm:$0xf] }
  0xc6   : > { %v667_v37 = vcombine.low %v659_v38, %v666_v43  ;;  %v1057_v44 = vcombine.low %v1035_v42, %v1042_v34  ;;  %1497 = vmatprep.subr.mxu1 %v1571_v40  ;;  %1485 = vmatpush3.msra.mxu0 %v1136_v51  ;;  %v684_v3 = vsub.s32 %v681_v60, %v1636_v28  ;;  %v1284_v34 = vld [vmem:[%s1862_s3] sm:$0x1] }
  0xc7   : > { %v1058_v45 = vcombine.low %v1049_v35, %v1056_v36  ;;  %1498 = vmatpush3.msra.mxu1 %v1131_v50  ;;  %1486 = vmatprep.subr.mxu0 %v1571_v40  ;;  %v689_v0 = vsub.s32 %v686_v61, %v1636_v28  ;;  %v696_v2 = vsub.s32 %v693_v63, %v1636_v28 }
  0xc8   : > { %678 = vperm.xlu1 %1540, %v667_v37   ;;  %v1065_v46 = vrot.slane %v1057_v44, %v1663_v39  ;;  %1499 = vmatprep.subr.mxu1 %v1571_v40  ;;  %v703_v7 = vsub.s32 %v700_v1, %v1636_v28 }
  0xc9   : > { %v1072_v47 = vrot.slane %v1058_v45, %v1663_v39  ;;  %1500 = vmatpush3.msra.mxu1 %v1130_v52  ;;  %1487 = vmatpush3.msra.mxu0 %v1135_v53  ;;  %v1288_v45 = vld [vmem:[%s1864_s5] sm:$0x1] }
  0xca   : > { %1501 = vmatprep.subr.mxu1 %v1571_v40  ;;  %1503 = vmatprep.mubr.msk.f32.mxu1 %vm1572_vm1, %v1571_v40 }
  0xcb   : > { %v1073_v48 = vcombine.low %v1065_v46, %v1072_v47  ;;  %1502 = vmatpush3.msra.mxu1 %v1129_v54  ;;  %1488 = vmatprep.subr.mxu0 %v1571_v40  ;;  %v319_v18 = vld [vmem:[#allocation2] sm:$0x1]  ;;  %v725_v26 = vld [vmem:[#allocation3] sm:$0x1] }
  0xcc   : > { %1489 = vmatpush3.msra.mxu0 %v1134_v55  ;;  %1492 = vmatprep.mubr.msk.f32.mxu0 %vm1572_vm1, %v1571_v40 }
  0xcd   : > { %1084 = vperm.xlu1 %1540, %v1073_v48   ;;  %1490 = vmatprep.subr.mxu0 %v1571_v40 }
  0xce   : > { %1491 = vmatpush3.msra.mxu0 %v1133_v56 }
  0xcf   : > { %1506 = vmatprep.subr.mxu0 %v1571_v40 }
 0x124   : > { %v670_v5 = vpop.permute.xlu0 %669 }
 0x125   : > { %v685_v9 = vrot.slane %v670_v5, %v684_v3 }
 0x12a   : > { %v673_v57 = vpop.permute.xlu1 %672 }
 0x12b   : > { %v690_v6 = vrot.slane %v673_v57, %v689_v0 }
 0x12d   : > { %v692_v10 = vsel %vm691_vm2, %v690_v6, %v685_v9 }
 0x12e   : > { %v1076_v58 = vpop.permute.xlu1 %1075 }
 0x12f   : > { %v1089_v16 = vrot.slane %v1076_v58, %v684_v3 }
 0x133   : > { %v1079_v59 = vpop.permute.xlu1 %1078 }
 0x134   : > { %v1093_v12 = vrot.slane %v1079_v59, %v689_v0 }
 0x136   : > { %v1094_v19 = vsel %vm691_vm2, %v1093_v12, %v1089_v16 }
 0x138   : > { %v676_v62 = vpop.permute.xlu1 %675 }
 0x139   : > { %v697_v8 = vrot.slane %v676_v62, %v696_v2 }
 0x13b   : > { %v699_v13 = vsel %vm698_vm3, %v697_v8, %v692_v10 }
 0x13e   : > { %v1082_v4 = vpop.permute.xlu1 %1081 }
 0x13f   : > { %v1098_v14 = vrot.slane %v1082_v4, %v696_v2 }
 0x141   : > { %v1099_v22 = vsel %vm698_vm3, %v1098_v14, %v1094_v19 }
 0x143   : > { %v679_v25 = vpop.permute.xlu1 %678 }
 0x144   : > { %v704_v11 = vrot.slane %v679_v25, %v703_v7 }
 0x146   : > { %v706_v15 = vsel %vm705_vm4, %v704_v11, %v699_v13 }
 0x147   : > { %v713_v17 = vrot.slane %v706_v15, %v1663_v39 }
 0x148   : > { %v1085_v28 = vpop.permute.xlu1 %1084 }
 0x149   : > { %v720_v20 = vrot.slane %v713_v17, %v1663_v39  ;;  %v1103_v21 = vrot.slane %v1085_v28, %v703_v7 }
 0x14b   : > { %v722_v30 = vadd.f32 %v720_v20, %v319_v18  ;;  %v1104_v23 = vsel %vm705_vm4, %v1103_v21, %v1099_v22 }
 0x14c   : > { %v1111_v24 = vrot.slane %v1104_v23, %v1663_v39 }
 0x14d   : > { %724 = vst.msk [vmem:[#allocation2] sm:$0x1] %vm316_vm0, %v722_v30 }
 0x14e   : > { %v1118_v31 = vrot.slane %v1111_v24, %v1663_v39 }
 0x150   : > { %v1120_v27 = vadd.f32 %v1118_v31, %v725_v26 }
 0x152   : > { %1121 = vst.msk [vmem:[#allocation3] sm:$0x1] %vm316_vm0, %v1120_v27 }
 0x154   : > { %v1125_v29 = vld [vmem:[#allocation2] sm:$0x1] }
 0x155   : > { %v1126_v38 = vmul.f32 0.00390625, %v1125_v29 }
 0x157   : > { %1504 = vmatmul.mubr.msk.f32.vlgmr.msra.gmra.mxu1 %vm1137_vm5, %v1126_v38 }
 0x159   : > { %v1127_v41 = vld [vmem:[#allocation3] sm:$0x1] }
 0x15a   : > { %v1128_v32 = vmul.f32 0.00390625, %v1127_v41 }
 0x15c   : > { %1493 = vmatmul.mubr.msk.f32.vlgmr.msra.gmra.mxu0 %vm1137_vm5, %v1128_v32 }
 0x15d   : > { %1508 = vmatprep.mubr.msk.f32.mxu0 %vm1572_vm1, %v1571_v40  ;;  %1507 = vmatpush3.msk.msra.mxu0 %vm1293_vm6, %v1287_v33 }
 0x217   : > { %v1280_v39 = vpop.f32.mrf.mxu1 }
 0x219   : > { %v1505_v42 = vpop.f32.mrf.mxu1 }
 0x21c   : > { %v1207_v43 = vpop.f32.mrf.mxu0 }
 0x21d   : > { %v1281_v35 = vadd.f32 %v1280_v39, %v1207_v43 }
 0x21e   : > { %v1494_v36 = vpop.f32.mrf.mxu0 }
 0x21f   : > { %v1285_v37 = vadd.f32 %v1284_v34, %v1281_v35 }
 0x221   : > { %v1286_v44 = vmax.f32 %v1285_v37, 0.0 }
 0x223   : > { %1509 = vmatmul.mubr.msk.f32.vlgmr.msra.gmra.mxu0 %vm1289_vm7, %v1286_v44 }
 0x2e3   : > { %v1363_v40 = vpop.f32.mrf.mxu0 }
 0x2e4   : > { %v1364_v46 = vadd.f32 %v1363_v40, %v1288_v45 }
 0x2e5   : > { %v1510_v47 = vpop.f32.mrf.mxu0 }
 0x2e6   : > { %v1467_v48 = vmul.f32 -1.442695, %v1364_v46 }
 0x2e8   : > { %1541 = vpow2.f32 %v1467_v48 }
 0x2f5   : > { %v1542_v49 = vpop.eup %1541 }
 0x2f6   : > { %v1370_v50 = vadd.f32 1.0, %v1542_v49 }
 0x2f8   : > { %1543 = vrcp.f32 %v1370_v50 }
 0x305   : > { %v1544_v51 = vpop.eup %1543 }
 0x306   : > { %1374 = vst.msk [vmem:[%s311_s12] sm:$0x1] %vm1373_vm8, %v1544_v51 }
 0x307 PF: > { %s16_s23 = sadd.s32 1, %s1567_s23   ;;  %s1866_s21 = smov %s1563_s22 }
 0x308   : > { %p13_p5 = scmp.ge.s32.totalorder %s16_s23, 4   ;;  %s1867_s22 = smov %s1869_s24 }
 0x30a   :  { %15 = sbr.rel (!%p13_p5) target bundleno = 2 (0x2), region = 85 }

</bundles_post_ra>
